<compile_context>
chip_gen: v6e
topology: v6e:2x2x1
jax: 0.10.0
libtpu: 0.0.40
codegen_flags: <defaults>
</compile_context>

<pallas_src>
import functools

import jax
import jax.numpy as jnp
from jax.experimental import pallas as pl
from jax.experimental.pallas import tpu as pltpu

BN_EPS = 1e-5
_VMEM_LIMIT = 32 * 1024 * 1024  # explicit; safe on v5e/v6e (128 MiB) and v7x (64 MiB)


def _conv_stats_kernel(x_ref, w_ref, y_ref, psum_ref, psumsq_ref, *, hw_total, hw_tile):
    # x_ref:      (1, Cin, THW)  float32 input tile (NCHW-native)
    # w_ref:      (Cout, Cin)    bfloat16 1x1-conv weight
    # y_ref:      (1, Cout, THW) float32 conv output tile
    # psum_ref:   (1, Cout, 1)   per-batch running sum   (resident across HW tiles)
    # psumsq_ref: (1, Cout, 1)   per-batch running sum^2 (resident across HW tiles)
    t = pl.program_id(1)

    x = x_ref[0].astype(jnp.bfloat16)                       # cast in-kernel: no extra HBM pass
    y = jnp.dot(w_ref[...], x, preferred_element_type=jnp.float32)  # (Cout, THW) on MXU
    y_ref[0] = y

    if hw_total % hw_tile != 0:
        # Ragged last tile: mask out-of-range lanes so they do not pollute stats.
        lane = t * hw_tile + jax.lax.broadcasted_iota(jnp.int32, y.shape, dimension=1)
        y_stat = jnp.where(lane < hw_total, y, 0.0)
    else:
        y_stat = y

    ps = jnp.sum(y_stat, axis=1, keepdims=True)             # (Cout, 1)
    pss = jnp.sum(y_stat * y_stat, axis=1, keepdims=True)   # (Cout, 1)

    @pl.when(t == 0)
    def _():
        psum_ref[0] = ps
        psumsq_ref[0] = pss

    @pl.when(t > 0)
    def _():
        psum_ref[0] += ps
        psumsq_ref[0] += pss


def _bn_apply_kernel(y_ref, scale_ref, shift_ref, o_ref):
    # y_ref:  (1, Cout, THW) float32
    # scale:  (Cout, 1)      gamma * inv_std
    # shift:  (Cout, 1)      beta - mean * gamma * inv_std
    o_ref[0] = y_ref[0] * scale_ref[...] + shift_ref[...]


@jax.jit
def conv1x1_bn(x_nchw, w_oihw, gamma, beta):
    """x_nchw: (N, Cin, H, W); w_oihw: (Cout, Cin, 1, 1); gamma/beta: (Cout,)."""
    N, Cin, H, W = x_nchw.shape
    Cout = w_oihw.shape[0]
    HW = H * W

    # Free reshapes only -- no transposes, no padding copies.
    x3 = x_nchw.reshape(N, Cin, HW)
    w2 = w_oihw.reshape(Cout, Cin).astype(jnp.bfloat16)

    # HW tiling: full-extent tile for small spatial sizes (legal even if not a
    # multiple of 128); 512-wide lane-dense tiles for large images.
    if HW <= 1024:
        THW = HW
    else:
        THW = 512
    n_hw = pl.cdiv(HW, THW)

    kernel1 = functools.partial(_conv_stats_kernel, hw_total=HW, hw_tile=THW)
    y, psum, psumsq = pl.pallas_call(
        kernel1,
        out_shape=(
            jax.ShapeDtypeStruct((N, Cout, HW), jnp.float32),
            jax.ShapeDtypeStruct((N, Cout, 1), jnp.float32),
            jax.ShapeDtypeStruct((N, Cout, 1), jnp.float32),
        ),
        grid=(N, n_hw),
        in_specs=[
            pl.BlockSpec((1, Cin, THW), lambda n, t: (n, 0, t)),
            pl.BlockSpec((Cout, Cin), lambda n, t: (0, 0)),   # constant block: fetched once
        ],
        out_specs=(
            pl.BlockSpec((1, Cout, THW), lambda n, t: (n, 0, t)),
            pl.BlockSpec((1, Cout, 1), lambda n, t: (n, 0, 0)),   # resident accumulator
            pl.BlockSpec((1, Cout, 1), lambda n, t: (n, 0, 0)),   # resident accumulator
        ),
        compiler_params=pltpu.CompilerParams(
            dimension_semantics=("parallel", "arbitrary"),
            vmem_limit_bytes=_VMEM_LIMIT,
        ),
    )(x3, w2)

    # Fold batch statistics + BN affine into per-channel scale/shift (tiny).
    count = jnp.float32(N * HW)
    s = jnp.sum(psum, axis=(0, 2))                 # (Cout,)
    ss = jnp.sum(psumsq, axis=(0, 2))              # (Cout,)
    mean = s / count
    var = jnp.maximum(ss / count - mean * mean, 0.0)   # biased batch variance
    inv_std = jax.lax.rsqrt(var + BN_EPS)
    scale = (gamma * inv_std).astype(jnp.float32).reshape(Cout, 1)
    shift = (beta - mean * gamma * inv_std).astype(jnp.float32).reshape(Cout, 1)

    out = pl.pallas_call(
        _bn_apply_kernel,
        out_shape=jax.ShapeDtypeStruct((N, Cout, HW), jnp.float32),
        grid=(N, n_hw),
        in_specs=[
            pl.BlockSpec((1, Cout, THW), lambda n, t: (n, 0, t)),
            pl.BlockSpec((Cout, 1), lambda n, t: (0, 0)),
            pl.BlockSpec((Cout, 1), lambda n, t: (0, 0)),
        ],
        out_specs=pl.BlockSpec((1, Cout, THW), lambda n, t: (n, 0, t)),
        compiler_params=pltpu.CompilerParams(
            dimension_semantics=("parallel", "parallel"),
            vmem_limit_bytes=_VMEM_LIMIT,
        ),
    )(y, scale, shift)

    return out.reshape(N, Cout, H, W)


if __name__ == "__main__":
    # Small shapes consistent with the module (1x1 conv, Cin == Cout).
    N, C, H, W = 2, 128, 16, 16

    key = jax.random.PRNGKey(0)
    kx, kw = jax.random.split(key)

    x = jax.random.normal(kx, (N, C, H, W), dtype=jnp.float32)
    conv_w = jax.random.normal(kw, (C, C, 1, 1), dtype=jnp.float32) * 0.05
    bn_gamma = jnp.ones((C,), dtype=jnp.float32)
    bn_beta = jnp.zeros((C,), dtype=jnp.float32)

    out = conv1x1_bn(x, conv_w, bn_gamma, bn_beta)
    jax.block_until_ready(out)
    assert out.shape == (N, C, H, W), out.shape

    # Loose-tolerance sanity check against a pure-JAX f32 reference
    # (kernel uses bf16 MXU inputs with f32 accumulation).
    xf = x.reshape(N, C, H * W)
    wf = conv_w.reshape(C, C)
    y_ref = jnp.einsum("oc,nci->noi", wf, xf, precision="highest")
    m_ref = y_ref.mean(axis=(0, 2), keepdims=True)
    v_ref = ((y_ref - m_ref) ** 2).mean(axis=(0, 2), keepdims=True)
    ref = (y_ref - m_ref) * jax.lax.rsqrt(v_ref + BN_EPS)
    ref = (ref * bn_gamma.reshape(1, C, 1) + bn_beta.reshape(1, C, 1)).reshape(N, C, H, W)
    err = jnp.max(jnp.abs(out - ref))
    assert err < 0.1, float(err)

    print("KERNEL_OK")
</pallas_src>

<mosaic_0001>
module attributes {stable_mosaic.version = 11 : i64} {
  func.func @_conv_stats_kernel(%arg0: i32, %arg1: i32, %arg2: memref<1x128x256xf32, #tpu.memory_space<vmem>>, %arg3: memref<128x128xbf16, #tpu.memory_space<vmem>>, %arg4: memref<1x128x256xf32, #tpu.memory_space<vmem>>, %arg5: memref<1x128x1xf32, #tpu.memory_space<vmem>>, %arg6: memref<1x128x1xf32, #tpu.memory_space<vmem>>) attributes {dimension_semantics = [#tpu.dimension_semantics<parallel>, #tpu.dimension_semantics<arbitrary>], iteration_bounds = array<i64: 2, 1>, scalar_prefetch = 0 : i64, scratch_operands = 0 : i64, tpu.core_type = #tpu.core_type<tc>, window_params = [{transform_indices = @transform_0, window_bounds = array<i64: 1, 128, 256>}, {pipeline_mode = #tpu.pipeline_mode<synchronous>, transform_indices = @transform_1, window_bounds = array<i64: 128, 128>}, {transform_indices = @transform_2, window_bounds = array<i64: 1, 128, 256>}, {transform_indices = @transform_3, window_bounds = array<i64: 1, 128, 1>}, {transform_indices = @transform_4, window_bounds = array<i64: 1, 128, 1>}]} {
    %c0 = arith.constant 0 : index
    %c0_0 = arith.constant 0 : index
    %c0_1 = arith.constant 0 : index
    %0 = vector.load %arg2[%c0, %c0_0, %c0_1] : memref<1x128x256xf32, #tpu.memory_space<vmem>>, vector<1x128x256xf32>
    %1 = vector.shape_cast %0 : vector<1x128x256xf32> to vector<128x256xf32>
    %2 = arith.truncf %1 : vector<128x256xf32> to vector<128x256xbf16>
    %c0_2 = arith.constant 0 : index
    %c0_3 = arith.constant 0 : index
    %3 = vector.load %arg3[%c0_2, %c0_3] : memref<128x128xbf16, #tpu.memory_space<vmem>>, vector<128x128xbf16>
    %cst = arith.constant dense<0.000000e+00> : vector<128x256xf32>
    %4 = tpu.matmul %3, %2, %cst {dimension_numbers = #tpu.dot_dimension_numbers<[1], [0], [0], [1], [0, 0, 1, 1], [], []>} : vector<128x128xbf16>, vector<128x256xbf16>, vector<128x256xf32> -> vector<128x256xf32>
    %c0_4 = arith.constant 0 : index
    %c0_5 = arith.constant 0 : index
    %c0_6 = arith.constant 0 : index
    %5 = vector.load %arg4[%c0_4, %c0_5, %c0_6] : memref<1x128x256xf32, #tpu.memory_space<vmem>>, vector<1x128x256xf32>
    %6 = vector.shape_cast %5 : vector<1x128x256xf32> to vector<128x256xf32>
    %7 = vector.shape_cast %4 : vector<128x256xf32> to vector<1x128x256xf32>
    tpu.vector_store %arg4[%c0_4, %c0_5, %c0_6], %7 {strides = array<i32>} : memref<1x128x256xf32, #tpu.memory_space<vmem>>, vector<1x128x256xf32>,
    %cst_7 = arith.constant dense<0.000000e+00> : vector<128xf32>
    %8 = vector.multi_reduction <add>, %4, %cst_7 [1] : vector<128x256xf32> to vector<128xf32>
    %9 = vector.shape_cast %8 : vector<128xf32> to vector<128x1xf32>
    %10 = arith.mulf %4, %4 : vector<128x256xf32>
    %cst_8 = arith.constant dense<0.000000e+00> : vector<128xf32>
    %11 = vector.multi_reduction <add>, %10, %cst_8 [1] : vector<128x256xf32> to vector<128xf32>
    %12 = vector.shape_cast %11 : vector<128xf32> to vector<128x1xf32>
    %c0_i32 = arith.constant 0 : i32
    %13 = arith.cmpi eq, %arg1, %c0_i32 : i32
    %14 = arith.extui %13 : i1 to i32
    %c0_i32_9 = arith.constant 0 : i32
    %15 = arith.cmpi ne, %14, %c0_i32_9 : i32
    scf.if %15 {
      %c0_12 = arith.constant 0 : index
      %c0_13 = arith.constant 0 : index
      %c0_14 = arith.constant 0 : index
      %19 = vector.load %arg5[%c0_12, %c0_13, %c0_14] : memref<1x128x1xf32, #tpu.memory_space<vmem>>, vector<1x128x1xf32>
      %20 = vector.shape_cast %19 : vector<1x128x1xf32> to vector<128x1xf32>
      %21 = vector.shape_cast %9 : vector<128x1xf32> to vector<1x128x1xf32>
      tpu.vector_store %arg5[%c0_12, %c0_13, %c0_14], %21 {strides = array<i32>} : memref<1x128x1xf32, #tpu.memory_space<vmem>>, vector<1x128x1xf32>,
      %c0_15 = arith.constant 0 : index
      %c0_16 = arith.constant 0 : index
      %c0_17 = arith.constant 0 : index
      %22 = vector.load %arg6[%c0_15, %c0_16, %c0_17] : memref<1x128x1xf32, #tpu.memory_space<vmem>>, vector<1x128x1xf32>
      %23 = vector.shape_cast %22 : vector<1x128x1xf32> to vector<128x1xf32>
      %24 = vector.shape_cast %12 : vector<128x1xf32> to vector<1x128x1xf32>
      tpu.vector_store %arg6[%c0_15, %c0_16, %c0_17], %24 {strides = array<i32>} : memref<1x128x1xf32, #tpu.memory_space<vmem>>, vector<1x128x1xf32>,
    } else {
    }
    %c0_i32_10 = arith.constant 0 : i32
    %16 = arith.cmpi sgt, %arg1, %c0_i32_10 : i32
    %17 = arith.extui %16 : i1 to i32
    %c0_i32_11 = arith.constant 0 : i32
    %18 = arith.cmpi ne, %17, %c0_i32_11 : i32
    scf.if %18 {
      %c0_12 = arith.constant 0 : index
      %c0_13 = arith.constant 0 : index
      %c0_14 = arith.constant 0 : index
      %19 = vector.load %arg5[%c0_12, %c0_13, %c0_14] : memref<1x128x1xf32, #tpu.memory_space<vmem>>, vector<1x128x1xf32>
      %20 = vector.shape_cast %19 : vector<1x128x1xf32> to vector<128x1xf32>
      %21 = arith.addf %20, %9 : vector<128x1xf32>
      %c0_15 = arith.constant 0 : index
      %c0_16 = arith.constant 0 : index
      %c0_17 = arith.constant 0 : index
      %22 = vector.load %arg5[%c0_15, %c0_16, %c0_17] : memref<1x128x1xf32, #tpu.memory_space<vmem>>, vector<1x128x1xf32>
      %23 = vector.shape_cast %22 : vector<1x128x1xf32> to vector<128x1xf32>
      %24 = vector.shape_cast %21 : vector<128x1xf32> to vector<1x128x1xf32>
      tpu.vector_store %arg5[%c0_15, %c0_16, %c0_17], %24 {strides = array<i32>} : memref<1x128x1xf32, #tpu.memory_space<vmem>>, vector<1x128x1xf32>,
      %c0_18 = arith.constant 0 : index
      %c0_19 = arith.constant 0 : index
      %c0_20 = arith.constant 0 : index
      %25 = vector.load %arg6[%c0_18, %c0_19, %c0_20] : memref<1x128x1xf32, #tpu.memory_space<vmem>>, vector<1x128x1xf32>
      %26 = vector.shape_cast %25 : vector<1x128x1xf32> to vector<128x1xf32>
      %27 = arith.addf %26, %12 : vector<128x1xf32>
      %c0_21 = arith.constant 0 : index
      %c0_22 = arith.constant 0 : index
      %c0_23 = arith.constant 0 : index
      %28 = vector.load %arg6[%c0_21, %c0_22, %c0_23] : memref<1x128x1xf32, #tpu.memory_space<vmem>>, vector<1x128x1xf32>
      %29 = vector.shape_cast %28 : vector<1x128x1xf32> to vector<128x1xf32>
      %30 = vector.shape_cast %27 : vector<128x1xf32> to vector<1x128x1xf32>
      tpu.vector_store %arg6[%c0_21, %c0_22, %c0_23], %30 {strides = array<i32>} : memref<1x128x1xf32, #tpu.memory_space<vmem>>, vector<1x128x1xf32>,
    } else {
    }
    return
  }
  func.func @transform_0(%arg0: i32, %arg1: i32) -> (i32, i32, i32) {
    %c0_i32 = arith.constant 0 : i32
    %c0_i32_0 = arith.constant 0 : i32
    return %arg0, %c0_i32, %arg1 : i32, i32, i32
  }
  func.func @transform_1(%arg0: i32, %arg1: i32) -> (i32, i32) {
    %c0_i32 = arith.constant 0 : i32
    %c0_i32_0 = arith.constant 0 : i32
    %c0_i32_1 = arith.constant 0 : i32
    return %c0_i32, %c0_i32_0 : i32, i32
  }
  func.func @transform_2(%arg0: i32, %arg1: i32) -> (i32, i32, i32) {
    %c0_i32 = arith.constant 0 : i32
    %c0_i32_0 = arith.constant 0 : i32
    return %arg0, %c0_i32, %arg1 : i32, i32, i32
  }
  func.func @transform_3(%arg0: i32, %arg1: i32) -> (i32, i32, i32) {
    %c0_i32 = arith.constant 0 : i32
    %c0_i32_0 = arith.constant 0 : i32
    %c0_i32_1 = arith.constant 0 : i32
    return %arg0, %c0_i32, %c0_i32_0 : i32, i32, i32
  }
  func.func @transform_4(%arg0: i32, %arg1: i32) -> (i32, i32, i32) {
    %c0_i32 = arith.constant 0 : i32
    %c0_i32_0 = arith.constant 0 : i32
    %c0_i32_1 = arith.constant 0 : i32
    return %arg0, %c0_i32, %c0_i32_0 : i32, i32, i32
  }
}

module attributes {stable_mosaic.version = 11 : i64} {
  func.func @_bn_apply_kernel(%arg0: i32, %arg1: i32, %arg2: memref<1x128x256xf32, #tpu.memory_space<vmem>>, %arg3: memref<128x1xf32, #tpu.memory_space<vmem>>, %arg4: memref<128x1xf32, #tpu.memory_space<vmem>>, %arg5: memref<1x128x256xf32, #tpu.memory_space<vmem>>) attributes {dimension_semantics = [#tpu.dimension_semantics<parallel>, #tpu.dimension_semantics<parallel>], iteration_bounds = array<i64: 2, 1>, scalar_prefetch = 0 : i64, scratch_operands = 0 : i64, tpu.core_type = #tpu.core_type<tc>, window_params = [{transform_indices = @transform_0, window_bounds = array<i64: 1, 128, 256>}, {pipeline_mode = #tpu.pipeline_mode<synchronous>, transform_indices = @transform_1, window_bounds = array<i64: 128, 1>}, {pipeline_mode = #tpu.pipeline_mode<synchronous>, transform_indices = @transform_2, window_bounds = array<i64: 128, 1>}, {transform_indices = @transform_3, window_bounds = array<i64: 1, 128, 256>}]} {
    %c0 = arith.constant 0 : index
    %c0_0 = arith.constant 0 : index
    %c0_1 = arith.constant 0 : index
    %0 = vector.load %arg2[%c0, %c0_0, %c0_1] : memref<1x128x256xf32, #tpu.memory_space<vmem>>, vector<1x128x256xf32>
    %1 = vector.shape_cast %0 : vector<1x128x256xf32> to vector<128x256xf32>
    %c0_2 = arith.constant 0 : index
    %c0_3 = arith.constant 0 : index
    %2 = vector.load %arg3[%c0_2, %c0_3] : memref<128x1xf32, #tpu.memory_space<vmem>>, vector<128x1xf32>
    %3 = vector.broadcast %2 : vector<128x1xf32> to vector<128x256xf32>
    %4 = arith.mulf %1, %3 : vector<128x256xf32>
    %c0_4 = arith.constant 0 : index
    %c0_5 = arith.constant 0 : index
    %5 = vector.load %arg4[%c0_4, %c0_5] : memref<128x1xf32, #tpu.memory_space<vmem>>, vector<128x1xf32>
    %6 = vector.broadcast %5 : vector<128x1xf32> to vector<128x256xf32>
    %7 = arith.addf %4, %6 : vector<128x256xf32>
    %c0_6 = arith.constant 0 : index
    %c0_7 = arith.constant 0 : index
    %c0_8 = arith.constant 0 : index
    %8 = vector.load %arg5[%c0_6, %c0_7, %c0_8] : memref<1x128x256xf32, #tpu.memory_space<vmem>>, vector<1x128x256xf32>
    %9 = vector.shape_cast %8 : vector<1x128x256xf32> to vector<128x256xf32>
    %10 = vector.shape_cast %7 : vector<128x256xf32> to vector<1x128x256xf32>
    tpu.vector_store %arg5[%c0_6, %c0_7, %c0_8], %10 {strides = array<i32>} : memref<1x128x256xf32, #tpu.memory_space<vmem>>, vector<1x128x256xf32>,
    return
  }
  func.func @transform_0(%arg0: i32, %arg1: i32) -> (i32, i32, i32) {
    %c0_i32 = arith.constant 0 : i32
    %c0_i32_0 = arith.constant 0 : i32
    return %arg0, %c0_i32, %arg1 : i32, i32, i32
  }
  func.func @transform_1(%arg0: i32, %arg1: i32) -> (i32, i32) {
    %c0_i32 = arith.constant 0 : i32
    %c0_i32_0 = arith.constant 0 : i32
    %c0_i32_1 = arith.constant 0 : i32
    return %c0_i32, %c0_i32_0 : i32, i32
  }
  func.func @transform_2(%arg0: i32, %arg1: i32) -> (i32, i32) {
    %c0_i32 = arith.constant 0 : i32
    %c0_i32_0 = arith.constant 0 : i32
    %c0_i32_1 = arith.constant 0 : i32
    return %c0_i32, %c0_i32_0 : i32, i32
  }
  func.func @transform_3(%arg0: i32, %arg1: i32) -> (i32, i32, i32) {
    %c0_i32 = arith.constant 0 : i32
    %c0_i32_0 = arith.constant 0 : i32
    return %arg0, %c0_i32, %arg1 : i32, i32, i32
  }
}

</mosaic_0001>

<bundles_post_ra>
// kernel: conv1x1_bn.3
= control target key start
LH: loop header
LB: loop body
LE: loop exit
PB: predicated region body
PF: predicated region fallthrough
CT: control target
= control target key end

     0   :  { %s702_s12 = smov 0   ;;  %s704_s13 = smov 0   ;;  %s943_s0 = inlined_call_operand.vmem [shape: f32[2,128,256], index: 0, kind: input, shape index: {}]   ;;  %s944_s1 = inlined_call_operand.vmem [shape: f32[128,1], index: 1, kind: input, shape index: {}]   ;;  %s945_s2 = inlined_call_operand.vmem [shape: f32[128,1], index: 2, kind: input, shape index: {}]   ;;  %s946_s3 = inlined_call_operand.vmem [shape: f32[2,128,256], index: 3, kind: output, shape index: {}]  }
   0x1   :  { %s706_s14 = smov 0  }
   0x2 LB: > { %s25_s15 = sadd.s32 1, %s675_s13  ;;  %p621_p0 = scmp.ge.s32.totalorder %s679_s14, 1  ;;  %s679_s14 = sphi %s706_s14, %s13_s14   ;;  %s675_s13 = sphi %s704_s13, %s948_s13   ;;  %s671_s12 = sphi %s702_s12, %s947_s12  }
   0x3   : > { %p27_p1 = scmp.ge.s32.totalorder %s25_s15, 2  ;;  %p158_p2 = scmp.lt.s32.totalorder %s679_s14, 3 }
   0x5   : > { %s950_s15 = smov (%p27_p1, %s25_s15), 0  ;;  %p159_p3 = pnand %p621_p0, %p158_p2 }
   0x6   : > { %p191_p4 = scmp.lt.s32.totalorder (!%p159_p3), %s671_s12, 1 }
   0x7   : > { %162 = sbr.rel (%p159_p3) target bundleno = 202 (0xca), region = 32 }
   0xc   : > { %v244_v0 = vld [vmem:[%s944_s1 + $0x10] sm:$0xff]  ;;  %v242_v1 = vld [vmem:[%s944_s1] sm:$0xff]  ;;  %v681_v2 = vmov 0   ;;  %v245_v3 = vld [vmem:[%s944_s1 + $0x18] sm:$0xff]  ;;  %s952_s12 = smov (!%p191_p4, %s671_s12), 1 }
   0xd   : > { %656 = vset.pattern.permute.xlu1 %v681_v2  ;;  %655 = vset.pattern.permute.xlu0 %v681_v2  ;;  %v243_v4 = vld [vmem:[%s944_s1 + $0x8] sm:$0xff]  ;;  %v246_v6 = vld [vmem:[%s944_s1 + $0x20] sm:$0xff]  ;;  %v249_v7 = vld [vmem:[%s944_s1 + $0x38] sm:$0xff]  ;;  %s628_s7 = sshll.u32 %s952_s12, 8 }
   0xe   : > { %270 = vperm.xlu1 %656, %v244_v0   ;;  %260 = vperm.xlu0 %655, %v242_v1   ;;  %v247_v5 = vld [vmem:[%s944_s1 + $0x28] sm:$0xff]  ;;  %v248_v8 = vld [vmem:[%s944_s1 + $0x30] sm:$0xff]  ;;  %v250_v10 = vld [vmem:[%s944_s1 + $0x40] sm:$0xff]  ;;  %s835_s10 = scalar_lea.vmem %s943_s0, %s628_s7  ;;  %s856_s16 = scalar_lea.vmem %s946_s3, %s628_s7 }
   0xf   : > { %v251_v9 = vld [vmem:[%s944_s1 + $0x48] sm:$0xff]  ;;  %v253_v11 = vld [vmem:[%s944_s1 + $0x58] sm:$0xff]  ;;  %v252_v12 = vld [vmem:[%s944_s1 + $0x50] sm:$0xff] }
  0x10   : > { %v255_v13 = vld [vmem:[%s944_s1 + $0x68] sm:$0xff]  ;;  %v254_v14 = vld [vmem:[%s944_s1 + $0x60] sm:$0xff]  ;;  %v257_v15 = vld [vmem:[%s944_s1 + $0x78] sm:$0xff] }
  0x11   : > { %v256_v16 = vld [vmem:[%s944_s1 + $0x70] sm:$0xff]  ;;  %v371_v17 = vld [vmem:[%s945_s2 + $0x8] sm:$0xff]  ;;  %v370_v18 = vld [vmem:[%s945_s2] sm:$0xff] }
  0x12   : > { %275 = vperm.xlu1 %656, %v245_v3   ;;  %265 = vperm.xlu0 %655, %v243_v4   ;;  %v373_v19 = vld [vmem:[%s945_s2 + $0x18] sm:$0xff]  ;;  %v372_v20 = vld [vmem:[%s945_s2 + $0x10] sm:$0xff]  ;;  %v375_v21 = vld [vmem:[%s945_s2 + $0x28] sm:$0xff] }
  0x13   : > { %v374_v22 = vld [vmem:[%s945_s2 + $0x20] sm:$0xff]  ;;  %v377_v23 = vld [vmem:[%s945_s2 + $0x38] sm:$0xff]  ;;  %v376_v24 = vld [vmem:[%s945_s2 + $0x30] sm:$0xff] }
  0x14   : > { %v379_v25 = vld [vmem:[%s945_s2 + $0x48] sm:$0xff]  ;;  %v378_v26 = vld [vmem:[%s945_s2 + $0x40] sm:$0xff]  ;;  %v381_v27 = vld [vmem:[%s945_s2 + $0x58] sm:$0xff] }
  0x15   : > { %v380_v28 = vld [vmem:[%s945_s2 + $0x50] sm:$0xff]  ;;  %v383_v29 = vld [vmem:[%s945_s2 + $0x68] sm:$0xff]  ;;  %v382_v30 = vld [vmem:[%s945_s2 + $0x60] sm:$0xff] }
  0x16   : > { %285 = vperm.xlu1 %656, %v247_v5   ;;  %280 = vperm.xlu0 %655, %v246_v6   ;;  %v385_v31 = vld [vmem:[%s945_s2 + $0x78] sm:$0xff]  ;;  %v384_v32 = vld [vmem:[%s945_s2 + $0x70] sm:$0xff]  ;;  %v210_v47 = vld [vmem:[%s835_s10] sm:$0xff] }
  0x17   : > { %v211_v48 = vld [vmem:[%s835_s10 + $0x8] sm:$0xff]  ;;  %v212_v49 = vld [vmem:[%s835_s10 + $0x10] sm:$0xff]  ;;  %v213_v50 = vld [vmem:[%s835_s10 + $0x18] sm:$0xff] }
  0x18   : > { %v214_v53 = vld [vmem:[%s835_s10 + $0x20] sm:$0xff]  ;;  %v215_v58 = vld [vmem:[%s835_s10 + $0x28] sm:$0xff]  ;;  %v216_v59 = vld [vmem:[%s835_s10 + $0x30] sm:$0xff] }
  0x19   : > { %v217_v60 = vld [vmem:[%s835_s10 + $0x38] sm:$0xff] }
  0x1a   : > { %295 = vperm.xlu1 %656, %v249_v7   ;;  %290 = vperm.xlu0 %655, %v248_v8   ;;  %v220_v7 = vld [vmem:[%s835_s10 + $0x50] sm:$0xff]  ;;  %v221_v8 = vld [vmem:[%s835_s10 + $0x58] sm:$0xff] }
  0x1e   : > { %305 = vperm.xlu1 %656, %v251_v9   ;;  %300 = vperm.xlu0 %655, %v250_v10   ;;  %v218_v9 = vld [vmem:[%s835_s10 + $0x40] sm:$0xff]  ;;  %v219_v10 = vld [vmem:[%s835_s10 + $0x48] sm:$0xff] }
  0x22   : > { %315 = vperm.xlu1 %656, %v253_v11   ;;  %310 = vperm.xlu0 %655, %v252_v12  }
  0x26   : > { %325 = vperm.xlu1 %656, %v255_v13   ;;  %320 = vperm.xlu0 %655, %v254_v14  }
  0x2a   : > { %335 = vperm.xlu1 %656, %v257_v15   ;;  %330 = vperm.xlu0 %655, %v256_v16  }
  0x2e   : > { %393 = vperm.xlu1 %656, %v371_v17   ;;  %388 = vperm.xlu0 %655, %v370_v18  }
  0x32   : > { %403 = vperm.xlu1 %656, %v373_v19   ;;  %398 = vperm.xlu0 %655, %v372_v20  }
  0x36   : > { %413 = vperm.xlu1 %656, %v375_v21   ;;  %408 = vperm.xlu0 %655, %v374_v22   ;;  %v224_v21 = vld [vmem:[%s835_s10 + $0x70] sm:$0xff]  ;;  %v225_v22 = vld [vmem:[%s835_s10 + $0x78] sm:$0xff] }
  0x3a   : > { %423 = vperm.xlu1 %656, %v377_v23   ;;  %418 = vperm.xlu0 %655, %v376_v24   ;;  %v222_v23 = vld [vmem:[%s835_s10 + $0x60] sm:$0xff]  ;;  %v223_v24 = vld [vmem:[%s835_s10 + $0x68] sm:$0xff] }
  0x3e   : > { %433 = vperm.xlu1 %656, %v379_v25   ;;  %428 = vperm.xlu0 %655, %v378_v26  }
  0x42   : > { %443 = vperm.xlu1 %656, %v381_v27   ;;  %438 = vperm.xlu0 %655, %v380_v28  }
  0x46   : > { %453 = vperm.xlu1 %656, %v383_v29   ;;  %448 = vperm.xlu0 %655, %v382_v30  }
  0x4a   : > { %463 = vperm.xlu1 %656, %v385_v31   ;;  %458 = vperm.xlu0 %655, %v384_v32  }
  0x89   : > { %v271_v33 = vpop.permute.xlu1 %270  ;;  %v261_v34 = vpop.permute.xlu0 %260 }
  0x8a   : > { %v338_v54 = vmul.f32 %v261_v34, %v210_v47  ;;  %v339_v55 = vmul.f32 %v261_v34, %v211_v48  ;;  %v342_v3 = vmul.f32 %v271_v33, %v214_v53  ;;  %v343_v4 = vmul.f32 %v271_v33, %v215_v58  ;;  %v233_v58 = vld [vmem:[%s835_s10 + $0xb8] sm:$0xff] }
  0x8d   : > { %v276_v35 = vpop.permute.xlu1 %275  ;;  %v266_v36 = vpop.permute.xlu0 %265 }
  0x8e   : > { %v340_v56 = vmul.f32 %v266_v36, %v212_v49  ;;  %v341_v57 = vmul.f32 %v266_v36, %v213_v50  ;;  %v344_v5 = vmul.f32 %v276_v35, %v216_v59  ;;  %v345_v6 = vmul.f32 %v276_v35, %v217_v60  ;;  %v228_v35 = vld [vmem:[%s835_s10 + $0x90] sm:$0xff]  ;;  %v229_v36 = vld [vmem:[%s835_s10 + $0x98] sm:$0xff]  ;;  %v230_v59 = vld [vmem:[%s835_s10 + $0xa0] sm:$0xff] }
  0x8f   : > { %v231_v60 = vld [vmem:[%s835_s10 + $0xa8] sm:$0xff] }
  0x91   : > { %v286_v37 = vpop.permute.xlu1 %285  ;;  %v281_v38 = vpop.permute.xlu0 %280 }
  0x92   : > { %v348_v17 = vmul.f32 %v286_v37, %v220_v7  ;;  %v349_v18 = vmul.f32 %v286_v37, %v221_v8  ;;  %v346_v19 = vmul.f32 %v281_v38, %v218_v9  ;;  %v347_v20 = vmul.f32 %v281_v38, %v219_v10  ;;  %v226_v37 = vld [vmem:[%s835_s10 + $0x80] sm:$0xff]  ;;  %v227_v38 = vld [vmem:[%s835_s10 + $0x88] sm:$0xff] }
  0x93   : > { %v234_v7 = vld [vmem:[%s835_s10 + $0xc0] sm:$0xff]  ;;  %v235_v8 = vld [vmem:[%s835_s10 + $0xc8] sm:$0xff] }
  0x95   : > { %v818_v39 = vpop.permute.xlu1 %295  ;;  %v820_v40 = vpop.permute.xlu0 %290 }
  0x96   : > { %v352_v31 = vmul.f32 %v818_v39, %v224_v21  ;;  %v353_v32 = vmul.f32 %v818_v39, %v225_v22  ;;  %v350_v33 = vmul.f32 %v820_v40, %v222_v23  ;;  %v351_v34 = vmul.f32 %v820_v40, %v223_v24 }
  0x99   : > { %v823_v41 = vpop.permute.xlu1 %305  ;;  %v825_v42 = vpop.permute.xlu0 %300 }
  0x9a   : > { %v356_v53 = vmul.f32 %v823_v41, %v228_v35 }
  0x9d   : > { %v828_v43 = vpop.permute.xlu1 %315  ;;  %v830_v44 = vpop.permute.xlu0 %310 }
  0xa1   : > { %v837_v45 = vpop.permute.xlu1 %325  ;;  %v839_v46 = vpop.permute.xlu0 %320 }
  0xa5   : > { %v845_v51 = vpop.permute.xlu1 %335  ;;  %v847_v52 = vpop.permute.xlu0 %330 }
  0xa9   : > { %v394_v61 = vpop.permute.xlu1 %393  ;;  %v389_v62 = vpop.permute.xlu0 %388 }
  0xaa   : > { %v468_v63 = vadd.f32 %v394_v61, %v340_v56  ;;  %v469_v0 = vadd.f32 %v394_v61, %v341_v57  ;;  %v466_v1 = vadd.f32 %v389_v62, %v338_v54  ;;  %v467_v2 = vadd.f32 %v389_v62, %v339_v55  ;;  %v232_v57 = vld [vmem:[%s835_s10 + $0xb0] sm:$0xff] }
  0xab   : > { %v357_v54 = vmul.f32 %v823_v41, %v229_v36  ;;  %v354_v55 = vmul.f32 %v825_v42, %v226_v37  ;;  %v355_v56 = vmul.f32 %v825_v42, %v227_v38 }
  0xac   : > { %500 = vst [vmem:[%s856_s16 + $0x10] sm:$0xff] %v468_v63  ;;  %501 = vst [vmem:[%s856_s16 + $0x18] sm:$0xff] %v469_v0 }
  0xad   : > { %498 = vst [vmem:[%s856_s16] sm:$0xff] %v466_v1  ;;  %499 = vst [vmem:[%s856_s16 + $0x8] sm:$0xff] %v467_v2  ;;  %v404_v11 = vpop.permute.xlu1 %403  ;;  %v399_v12 = vpop.permute.xlu0 %398  ;;  %v360_v1 = vmul.f32 %v828_v43, %v232_v57  ;;  %v361_v2 = vmul.f32 %v828_v43, %v233_v58 }
  0xae   : > { %v472_v13 = vadd.f32 %v404_v11, %v344_v5  ;;  %v473_v14 = vadd.f32 %v404_v11, %v345_v6  ;;  %v470_v15 = vadd.f32 %v399_v12, %v342_v3  ;;  %v471_v16 = vadd.f32 %v399_v12, %v343_v4  ;;  %v236_v5 = vld [vmem:[%s835_s10 + $0xd0] sm:$0xff]  ;;  %v237_v6 = vld [vmem:[%s835_s10 + $0xd8] sm:$0xff] }
  0xaf   : > { %v358_v3 = vmul.f32 %v830_v44, %v230_v59  ;;  %v359_v4 = vmul.f32 %v830_v44, %v231_v60 }
  0xb0   : > { %504 = vst [vmem:[%s856_s16 + $0x30] sm:$0xff] %v472_v13  ;;  %505 = vst [vmem:[%s856_s16 + $0x38] sm:$0xff] %v473_v14  ;;  %v364_v13 = vmul.f32 %v837_v45, %v236_v5  ;;  %v365_v14 = vmul.f32 %v837_v45, %v237_v6 }
  0xb1   : > { %502 = vst [vmem:[%s856_s16 + $0x20] sm:$0xff] %v470_v15  ;;  %503 = vst [vmem:[%s856_s16 + $0x28] sm:$0xff] %v471_v16  ;;  %v414_v25 = vpop.permute.xlu1 %413  ;;  %v409_v26 = vpop.permute.xlu0 %408  ;;  %v362_v15 = vmul.f32 %v839_v46, %v234_v7  ;;  %v363_v16 = vmul.f32 %v839_v46, %v235_v8 }
  0xb2   : > { %v476_v27 = vadd.f32 %v414_v25, %v348_v17  ;;  %v477_v28 = vadd.f32 %v414_v25, %v349_v18  ;;  %v474_v29 = vadd.f32 %v409_v26, %v346_v19  ;;  %v475_v30 = vadd.f32 %v409_v26, %v347_v20  ;;  %v240_v17 = vld [vmem:[%s835_s10 + $0xf0] sm:$0xff]  ;;  %v241_v18 = vld [vmem:[%s835_s10 + $0xf8] sm:$0xff]  ;;  %v238_v19 = vld [vmem:[%s835_s10 + $0xe0] sm:$0xff] }
  0xb3   : > { %v239_v20 = vld [vmem:[%s835_s10 + $0xe8] sm:$0xff]  ;;  %v368_v46 = vmul.f32 %v845_v51, %v240_v17  ;;  %v369_v26 = vmul.f32 %v845_v51, %v241_v18 }
  0xb4   : > { %508 = vst [vmem:[%s856_s16 + $0x50] sm:$0xff] %v476_v27  ;;  %509 = vst [vmem:[%s856_s16 + $0x58] sm:$0xff] %v477_v28  ;;  %v366_v27 = vmul.f32 %v847_v52, %v238_v19  ;;  %v367_v28 = vmul.f32 %v847_v52, %v239_v20 }
  0xb5   : > { %506 = vst [vmem:[%s856_s16 + $0x40] sm:$0xff] %v474_v29  ;;  %507 = vst [vmem:[%s856_s16 + $0x48] sm:$0xff] %v475_v30  ;;  %v424_v47 = vpop.permute.xlu1 %423  ;;  %v419_v39 = vpop.permute.xlu0 %418 }
  0xb6   : > { %v480_v48 = vadd.f32 %v424_v47, %v352_v31  ;;  %v481_v40 = vadd.f32 %v424_v47, %v353_v32  ;;  %v478_v49 = vadd.f32 %v419_v39, %v350_v33  ;;  %v479_v50 = vadd.f32 %v419_v39, %v351_v34 }
  0xb8   : > { %512 = vst [vmem:[%s856_s16 + $0x70] sm:$0xff] %v480_v48  ;;  %513 = vst [vmem:[%s856_s16 + $0x78] sm:$0xff] %v481_v40 }
  0xb9   : > { %510 = vst [vmem:[%s856_s16 + $0x60] sm:$0xff] %v478_v49  ;;  %511 = vst [vmem:[%s856_s16 + $0x68] sm:$0xff] %v479_v50  ;;  %v434_v61 = vpop.permute.xlu1 %433  ;;  %v429_v41 = vpop.permute.xlu0 %428 }
  0xba   : > { %v484_v62 = vadd.f32 %v434_v61, %v356_v53  ;;  %v485_v42 = vadd.f32 %v434_v61, %v357_v54  ;;  %v482_v63 = vadd.f32 %v429_v41, %v354_v55  ;;  %v483_v0 = vadd.f32 %v429_v41, %v355_v56 }
  0xbc   : > { %516 = vst [vmem:[%s856_s16 + $0x90] sm:$0xff] %v484_v62  ;;  %517 = vst [vmem:[%s856_s16 + $0x98] sm:$0xff] %v485_v42 }
  0xbd   : > { %514 = vst [vmem:[%s856_s16 + $0x80] sm:$0xff] %v482_v63  ;;  %515 = vst [vmem:[%s856_s16 + $0x88] sm:$0xff] %v483_v0  ;;  %v444_v9 = vpop.permute.xlu1 %443  ;;  %v439_v43 = vpop.permute.xlu0 %438 }
  0xbe   : > { %v488_v10 = vadd.f32 %v444_v9, %v360_v1  ;;  %v489_v44 = vadd.f32 %v444_v9, %v361_v2  ;;  %v486_v11 = vadd.f32 %v439_v43, %v358_v3  ;;  %v487_v12 = vadd.f32 %v439_v43, %v359_v4 }
  0xc0   : > { %520 = vst [vmem:[%s856_s16 + $0xb0] sm:$0xff] %v488_v10  ;;  %521 = vst [vmem:[%s856_s16 + $0xb8] sm:$0xff] %v489_v44 }
  0xc1   : > { %518 = vst [vmem:[%s856_s16 + $0xa0] sm:$0xff] %v486_v11  ;;  %519 = vst [vmem:[%s856_s16 + $0xa8] sm:$0xff] %v487_v12  ;;  %v454_v21 = vpop.permute.xlu1 %453  ;;  %v449_v22 = vpop.permute.xlu0 %448 }
  0xc2   : > { %v492_v23 = vadd.f32 %v454_v21, %v364_v13  ;;  %v493_v45 = vadd.f32 %v454_v21, %v365_v14  ;;  %v490_v24 = vadd.f32 %v449_v22, %v362_v15  ;;  %v491_v25 = vadd.f32 %v449_v22, %v363_v16 }
  0xc4   : > { %524 = vst [vmem:[%s856_s16 + $0xd0] sm:$0xff] %v492_v23  ;;  %525 = vst [vmem:[%s856_s16 + $0xd8] sm:$0xff] %v493_v45 }
  0xc5   : > { %522 = vst [vmem:[%s856_s16 + $0xc0] sm:$0xff] %v490_v24  ;;  %523 = vst [vmem:[%s856_s16 + $0xc8] sm:$0xff] %v491_v25  ;;  %v464_v29 = vpop.permute.xlu1 %463  ;;  %v459_v30 = vpop.permute.xlu0 %458 }
  0xc6   : > { %v496_v31 = vadd.f32 %v464_v29, %v368_v46  ;;  %v497_v32 = vadd.f32 %v464_v29, %v369_v26  ;;  %v494_v33 = vadd.f32 %v459_v30, %v366_v27  ;;  %v495_v34 = vadd.f32 %v459_v30, %v367_v28 }
  0xc8   : > { %528 = vst [vmem:[%s856_s16 + $0xf0] sm:$0xff] %v496_v31  ;;  %529 = vst [vmem:[%s856_s16 + $0xf8] sm:$0xff] %v497_v32 }
  0xc9   : > { %526 = vst [vmem:[%s856_s16 + $0xe0] sm:$0xff] %v494_v33  ;;  %527 = vst [vmem:[%s856_s16 + $0xe8] sm:$0xff] %v495_v34 }
  0xca PF: > { %s13_s14 = sadd.s32 1, %s679_s14   ;;  %s947_s12 = smov %s675_s13 }
  0xcb   : > { %p10_p5 = scmp.ge.s32.totalorder %s13_s14, 4   ;;  %s948_s13 = smov %s950_s15 }
  0xcd   :  { %12 = sbr.rel (!%p10_p5) target bundleno = 2 (0x2), region = 62 }

// kernel: conv1x1_bn.2
= control target key start
LH: loop header
LB: loop body
LE: loop exit
PB: predicated region body
PF: predicated region fallthrough
CT: control target
= control target key end

     0   :  { %s1065_s15 = smov 0   ;;  %s1067_s16 = smov 0   ;;  %s1310_s0 = inlined_call_operand.vmem [shape: f32[2,128,256], index: 0, kind: input, shape index: {}]   ;;  %s1311_s1 = inlined_call_operand.vmem [shape: bf16[128,128], index: 1, kind: input, shape index: {}]   ;;  %s1312_s2 = inlined_call_operand.vmem [shape: f32[2,128,256], index: 2, kind: output, shape index: {0}]   ;;  %s1313_s3 = inlined_call_operand.vmem [shape: f32[2,128,1], index: 3, kind: output, shape index: {1}]   ;;  %s1314_s4 = inlined_call_operand.vmem [shape: f32[2,128,1], index: 4, kind: output, shape index: {2}]  }
   0x1   :  { %s1069_s17 = smov 0  }
   0x2 LB: > { %s27_s18 = sadd.s32 1, %s1033_s16  ;;  %p943_p0 = scmp.ge.s32.totalorder %s1037_s17, 1  ;;  %s1037_s17 = sphi %s1069_s17, %s15_s17   ;;  %s1033_s16 = sphi %s1067_s16, %s1316_s16   ;;  %s1029_s15 = sphi %s1065_s15, %s1315_s15  }
   0x3   : > { %p29_p1 = scmp.ge.s32.totalorder %s27_s18, 2  ;;  %p188_p2 = scmp.lt.s32.totalorder %s1037_s17, 3 }
   0x5   : > { %s1318_s18 = smov (%p29_p1, %s27_s18), 0  ;;  %p189_p3 = pnand %p943_p0, %p188_p2 }
   0x6   : > { %p233_p4 = scmp.lt.s32.totalorder (!%p189_p3), %s1029_s15, 1 }
   0x7   : > { %192 = sbr.rel (%p189_p3) target bundleno = 450 (0x1c2), region = 28 }
   0xc   : > { %v1039_v0 = vmov 0   ;;  %s1320_s15 = smov (!%p233_p4, %s1029_s15), 1  ;;  %v1007_v49 = vld [vmem:[%s1311_s1] sm:$0xff]   ;;  %v1009_v51 = vld [vmem:[%s1311_s1 + $0x8] sm:$0xff]   ;;  %v1011_v53 = vld [vmem:[%s1311_s1 + $0x10] sm:$0xff]   ;;  %vm652_vm0 = vcmask 7168  }
   0xd   : > { %407 = vmatprep.mubr.bf16.mxu0 %v1039_v0  ;;  %447 = vmatprep.mubr.bf16.mxu1 %v1039_v0  ;;  %s962_s19 = sshll.u32 %s1320_s15, 8  ;;  %v1008_v50 = vld [vmem:[%s1311_s1 + $0x20] sm:$0xff]   ;;  %v1010_v52 = vld [vmem:[%s1311_s1 + $0x28] sm:$0xff]   ;;  %v1012_v54 = vld [vmem:[%s1311_s1 + $0x30] sm:$0xff]  }
   0xe   : > { %s1093_s22 = scalar_lea.vmem %s1310_s0, %s962_s19  ;;  %v1013_v55 = vld [vmem:[%s1311_s1 + $0x18] sm:$0xff]   ;;  %s1162_s20 = scalar_lea.vmem %s1312_s2, %s962_s19 }
   0xf   : > { %v292_v1 = vld [vmem:[%s1093_s22 + $0xe8] sm:$0xff]  ;;  %v294_v2 = vld [vmem:[%s1093_s22 + $0xf8] sm:$0xff]  ;;  %v291_v3 = vld [vmem:[%s1093_s22 + $0xe0] sm:$0xff]  ;;  %s964_s19 = sshll.u32 %s1320_s15, 7 }
  0x10   : > { %v310_v4 = vpack.c.bf16 %v294_v2, %v292_v1  ;;  %v293_v5 = vld [vmem:[%s1093_s22 + $0xf0] sm:$0xff]  ;;  %v288_v6 = vld [vmem:[%s1093_s22 + $0xc8] sm:$0xff]  ;;  %v290_v7 = vld [vmem:[%s1093_s22 + $0xd8] sm:$0xff]  ;;  %s1230_s23 = scalar_lea.vmem %s1313_s3, %s964_s19  ;;  %s1241_s25 = scalar_lea.vmem %s1314_s4, %s964_s19 }
  0x11   : > { %v309_v8 = vpack.c.bf16 %v293_v5, %v291_v3  ;;  %v308_v9 = vpack.c.bf16 %v290_v7, %v288_v6  ;;  %v287_v10 = vld [vmem:[%s1093_s22 + $0xc0] sm:$0xff]  ;;  %v289_v11 = vld [vmem:[%s1093_s22 + $0xd0] sm:$0xff]  ;;  %v284_v12 = vld [vmem:[%s1093_s22 + $0xa8] sm:$0xff] }
  0x12   : > { %375 = vmatprep.subr.bf16.mxu0 %v310_v4  ;;  %966 = vmatprep.subr.bf16.mxu1 %v310_v4  ;;  %v286_v13 = vld [vmem:[%s1093_s22 + $0xb8] sm:$0xff]  ;;  %v307_v14 = vpack.c.bf16 %v289_v11, %v287_v10  ;;  %v283_v16 = vld [vmem:[%s1093_s22 + $0xa0] sm:$0xff]  ;;  %v285_v17 = vld [vmem:[%s1093_s22 + $0xb0] sm:$0xff] }
  0x13   : > { %376 = vmatpush1.bf16.msra.mxu0 %v309_v8  ;;  %974 = vmatpush1.bf16.msra.mxu1 %v309_v8  ;;  %v306_v15 = vpack.c.bf16 %v286_v13, %v284_v12  ;;  %v280_v18 = vld [vmem:[%s1093_s22 + $0x88] sm:$0xff]  ;;  %v282_v19 = vld [vmem:[%s1093_s22 + $0x98] sm:$0xff]  ;;  %v305_v20 = vpack.c.bf16 %v285_v17, %v283_v16  ;;  %v279_v22 = vld [vmem:[%s1093_s22 + $0x80] sm:$0xff] }
  0x14   : > { %377 = vmatprep.subr.bf16.mxu0 %v308_v9  ;;  %967 = vmatprep.subr.bf16.mxu1 %v308_v9  ;;  %v304_v21 = vpack.c.bf16 %v282_v19, %v280_v18  ;;  %v281_v23 = vld [vmem:[%s1093_s22 + $0x90] sm:$0xff]  ;;  %v276_v24 = vld [vmem:[%s1093_s22 + $0x68] sm:$0xff]  ;;  %v278_v25 = vld [vmem:[%s1093_s22 + $0x78] sm:$0xff] }
  0x15   : > { %v303_v26 = vpack.c.bf16 %v281_v23, %v279_v22  ;;  %v302_v27 = vpack.c.bf16 %v278_v25, %v276_v24  ;;  %v275_v28 = vld [vmem:[%s1093_s22 + $0x60] sm:$0xff]  ;;  %v277_v29 = vld [vmem:[%s1093_s22 + $0x70] sm:$0xff]  ;;  %v272_v30 = vld [vmem:[%s1093_s22 + $0x48] sm:$0xff] }
  0x16   : > { %v274_v31 = vld [vmem:[%s1093_s22 + $0x58] sm:$0xff]  ;;  %v301_v32 = vpack.c.bf16 %v277_v29, %v275_v28  ;;  %v271_v34 = vld [vmem:[%s1093_s22 + $0x40] sm:$0xff]  ;;  %v273_v35 = vld [vmem:[%s1093_s22 + $0x50] sm:$0xff] }
  0x17   : > { %378 = vmatpush1.bf16.msra.mxu0 %v307_v14  ;;  %975 = vmatpush1.bf16.msra.mxu1 %v307_v14  ;;  %v300_v33 = vpack.c.bf16 %v274_v31, %v272_v30  ;;  %v268_v36 = vld [vmem:[%s1093_s22 + $0x28] sm:$0xff]  ;;  %v270_v37 = vld [vmem:[%s1093_s22 + $0x38] sm:$0xff]  ;;  %v299_v38 = vpack.c.bf16 %v273_v35, %v271_v34  ;;  %v267_v40 = vld [vmem:[%s1093_s22 + $0x20] sm:$0xff] }
  0x18   : > { %379 = vmatprep.subr.bf16.mxu0 %v306_v15  ;;  %968 = vmatprep.subr.bf16.mxu1 %v306_v15  ;;  %v298_v39 = vpack.c.bf16 %v270_v37, %v268_v36  ;;  %v269_v41 = vld [vmem:[%s1093_s22 + $0x30] sm:$0xff]  ;;  %v264_v42 = vld [vmem:[%s1093_s22 + $0x8] sm:$0xff]  ;;  %v266_v43 = vld [vmem:[%s1093_s22 + $0x18] sm:$0xff] }
  0x19   : > { %v297_v44 = vpack.c.bf16 %v269_v41, %v267_v40  ;;  %v296_v45 = vpack.c.bf16 %v266_v43, %v264_v42  ;;  %v263_v46 = vld [vmem:[%s1093_s22] sm:$0xff]  ;;  %v265_v47 = vld [vmem:[%s1093_s22 + $0x10] sm:$0xff]  ;;  %v1014_v56 = vld [vmem:[%s1311_s1 + $0x38] sm:$0xff]  }
  0x1a   : > { %v295_v48 = vpack.c.bf16 %v265_v47, %v263_v46 }
  0x1b   : > { %380 = vmatpush1.bf16.msra.mxu0 %v305_v20  ;;  %976 = vmatpush1.bf16.msra.mxu1 %v305_v20 }
  0x1c   : > { %381 = vmatprep.subr.bf16.mxu0 %v304_v21  ;;  %969 = vmatprep.subr.bf16.mxu1 %v304_v21 }
  0x1f   : > { %382 = vmatpush1.bf16.msra.mxu0 %v303_v26  ;;  %977 = vmatpush1.bf16.msra.mxu1 %v303_v26 }
  0x20   : > { %383 = vmatprep.subr.bf16.mxu0 %v302_v27  ;;  %970 = vmatprep.subr.bf16.mxu1 %v302_v27 }
  0x23   : > { %384 = vmatpush1.bf16.msra.mxu0 %v301_v32  ;;  %978 = vmatpush1.bf16.msra.mxu1 %v301_v32 }
  0x24   : > { %385 = vmatprep.subr.bf16.mxu0 %v300_v33  ;;  %971 = vmatprep.subr.bf16.mxu1 %v300_v33 }
  0x27   : > { %386 = vmatpush1.bf16.msra.mxu0 %v299_v38  ;;  %979 = vmatpush1.bf16.msra.mxu1 %v299_v38 }
  0x28   : > { %387 = vmatprep.subr.bf16.mxu0 %v298_v39  ;;  %972 = vmatprep.subr.bf16.mxu1 %v298_v39 }
  0x2b   : > { %388 = vmatpush1.bf16.msra.mxu0 %v297_v44  ;;  %980 = vmatpush1.bf16.msra.mxu1 %v297_v44 }
  0x2c   : > { %389 = vmatprep.subr.bf16.mxu0 %v296_v45  ;;  %973 = vmatprep.subr.bf16.mxu1 %v296_v45 }
  0x2f   : > { %390 = vmatpush1.bf16.msra.mxu0 %v295_v48  ;;  %981 = vmatpush1.bf16.msra.mxu1 %v295_v48 }
  0x32   : > { %408 = vmatmul.mubr.bf16.vlgmr.msra.gmra.mxu0 %v1007_v49  ;;  %448 = vmatmul.mubr.bf16.vlgmr.msra.gmra.mxu1 %v1008_v50 }
  0x33   : > { %417 = vmatprep.mubr.bf16.mxu0 %v1039_v0  ;;  %457 = vmatprep.mubr.bf16.mxu1 %v1039_v0 }
  0x3a   : > { %418 = vmatmul.mubr.bf16.gmra.mxu0 %v1009_v51  ;;  %458 = vmatmul.mubr.bf16.gmra.mxu1 %v1010_v52 }
  0x3b   : > { %427 = vmatprep.mubr.bf16.mxu0 %v1039_v0  ;;  %467 = vmatprep.mubr.bf16.mxu1 %v1039_v0 }
  0x42   : > { %428 = vmatmul.mubr.bf16.gmra.mxu0 %v1011_v53  ;;  %468 = vmatmul.mubr.bf16.gmra.mxu1 %v1012_v54 }
  0x43   : > { %437 = vmatprep.mubr.bf16.mxu0 %v1039_v0  ;;  %477 = vmatprep.mubr.bf16.mxu1 %v1039_v0 }
  0x4a   : > { %438 = vmatmul.mubr.bf16.gmra.mxu0 %v1013_v55  ;;  %478 = vmatmul.mubr.bf16.gmra.mxu1 %v1014_v56 }
  0xf2   : > { %v409_v57 = vpop.f32.mrf.mxu0  ;;  %v449_v58 = vpop.f32.mrf.mxu1 }
  0xf3   : > { %488 = vst [vmem:[%s1162_s20] sm:$0xff] %v409_v57  ;;  %504 = vst [vmem:[%s1162_s20 + $0x80] sm:$0xff] %v449_v58  ;;  %v568_v2 = vmul.f32 %v409_v57, %v409_v57  ;;  %v584_v18 = vmul.f32 %v449_v58, %v449_v58 }
  0xf4   : > { %v411_v59 = vpop.f32.mrf.mxu0  ;;  %v451_v60 = vpop.f32.mrf.mxu1 }
  0xf5   : > { %489 = vst [vmem:[%s1162_s20 + $0x8] sm:$0xff] %v411_v59  ;;  %505 = vst [vmem:[%s1162_s20 + $0x88] sm:$0xff] %v451_v60  ;;  %v520_v61 = vadd.f32 %v411_v59, %v409_v57  ;;  %v544_v4 = vadd.f32 %v451_v60, %v449_v58  ;;  %v569_v5 = vmul.f32 %v411_v59, %v411_v59 }
  0xf6   : > { %v413_v62 = vpop.f32.mrf.mxu0  ;;  %v453_v63 = vpop.f32.mrf.mxu1  ;;  %v585_v14 = vmul.f32 %v451_v60, %v451_v60 }
  0xf7   : > { %490 = vst [vmem:[%s1162_s20 + $0x10] sm:$0xff] %v413_v62  ;;  %506 = vst [vmem:[%s1162_s20 + $0x90] sm:$0xff] %v453_v63  ;;  %521 = vadd.xlane.f32.xlu0 %v520_v61  ;;  %v570_v9 = vmul.f32 %v413_v62, %v413_v62  ;;  %v600_v12 = vadd.f32 %v569_v5, %v568_v2  ;;  %v586_v19 = vmul.f32 %v453_v63, %v453_v63 }
  0xf8   : > { %v415_v0 = vpop.f32.mrf.mxu0  ;;  %v455_v1 = vpop.f32.mrf.mxu1  ;;  %v624_v22 = vadd.f32 %v585_v14, %v584_v18 }
  0xf9   : > { %491 = vst [vmem:[%s1162_s20 + $0x18] sm:$0xff] %v415_v0  ;;  %507 = vst [vmem:[%s1162_s20 + $0x98] sm:$0xff] %v455_v1  ;;  %v547_v3 = vadd.f32 %v455_v1, %v453_v63  ;;  %v571_v6 = vmul.f32 %v415_v0, %v415_v0  ;;  %v587_v15 = vmul.f32 %v455_v1, %v455_v1 }
  0xfa   : > { %v419_v7 = vpop.f32.mrf.mxu0  ;;  %v459_v8 = vpop.f32.mrf.mxu1  ;;  %v523_v28 = vadd.f32 %v415_v0, %v413_v62 }
  0xfb   : > { %548 = vadd.xlane.f32.xlu1 %v547_v3  ;;  %545 = vadd.xlane.f32.xlu0 %v544_v4  ;;  %492 = vst [vmem:[%s1162_s20 + $0x20] sm:$0xff] %v419_v7  ;;  %508 = vst [vmem:[%s1162_s20 + $0xa0] sm:$0xff] %v459_v8  ;;  %v603_v13 = vadd.f32 %v571_v6, %v570_v9  ;;  %v627_v23 = vadd.f32 %v587_v15, %v586_v19 }
  0xfc   : > { %v421_v10 = vpop.f32.mrf.mxu0  ;;  %v461_v11 = vpop.f32.mrf.mxu1  ;;  %v572_v36 = vmul.f32 %v419_v7, %v419_v7  ;;  %v588_v40 = vmul.f32 %v459_v8, %v459_v8 }
  0xfd   : > { %493 = vst [vmem:[%s1162_s20 + $0x28] sm:$0xff] %v421_v10  ;;  %509 = vst [vmem:[%s1162_s20 + $0xa8] sm:$0xff] %v461_v11  ;;  %v526_v29 = vadd.f32 %v421_v10, %v419_v7  ;;  %v550_v34 = vadd.f32 %v461_v11, %v459_v8  ;;  %v573_v37 = vmul.f32 %v421_v10, %v421_v10 }
  0xfe   : > { %v423_v16 = vpop.f32.mrf.mxu0  ;;  %v1176_v17 = vpop.f32.mrf.mxu1  ;;  %v589_v41 = vmul.f32 %v461_v11, %v461_v11 }
  0xff   : > { %601 = vadd.xlane.f32.xlu0 %v600_v12  ;;  %604 = vadd.xlane.f32.xlu1 %v603_v13  ;;  %494 = vst [vmem:[%s1162_s20 + $0x30] sm:$0xff] %v423_v16  ;;  %510 = vst [vmem:[%s1162_s20 + $0xb0] sm:$0xff] %v1176_v17  ;;  %v606_v44 = vadd.f32 %v573_v37, %v572_v36  ;;  %v574_v46 = vmul.f32 %v423_v16, %v423_v16 }
 0x100   : > { %v425_v20 = vpop.f32.mrf.mxu0  ;;  %v465_v21 = vpop.f32.mrf.mxu1  ;;  %v630_v52 = vadd.f32 %v589_v41, %v588_v40  ;;  %v590_v54 = vmul.f32 %v1176_v17, %v1176_v17 }
 0x101   : > { %495 = vst [vmem:[%s1162_s20 + $0x38] sm:$0xff] %v425_v20  ;;  %511 = vst [vmem:[%s1162_s20 + $0xb8] sm:$0xff] %v465_v21  ;;  %v529_v35 = vadd.f32 %v425_v20, %v423_v16  ;;  %v553_v45 = vadd.f32 %v465_v21, %v1176_v17  ;;  %v575_v47 = vmul.f32 %v425_v20, %v425_v20 }
 0x102   : > { %v1183_v24 = vpop.f32.mrf.mxu0  ;;  %v1185_v25 = vpop.f32.mrf.mxu1  ;;  %v591_v55 = vmul.f32 %v465_v21, %v465_v21 }
 0x103   : > { %625 = vadd.xlane.f32.xlu0 %v624_v22  ;;  %628 = vadd.xlane.f32.xlu1 %v627_v23  ;;  %496 = vst [vmem:[%s1162_s20 + $0x40] sm:$0xff] %v1183_v24  ;;  %512 = vst [vmem:[%s1162_s20 + $0xc0] sm:$0xff] %v1185_v25  ;;  %v609_v53 = vadd.f32 %v575_v47, %v574_v46  ;;  %v576_v60 = vmul.f32 %v1183_v24, %v1183_v24 }
 0x104   : > { %v431_v26 = vpop.f32.mrf.mxu0  ;;  %v471_v27 = vpop.f32.mrf.mxu1  ;;  %v633_v56 = vadd.f32 %v591_v55, %v590_v54  ;;  %v592_v62 = vmul.f32 %v1185_v25, %v1185_v25 }
 0x105   : > { %497 = vst [vmem:[%s1162_s20 + $0x48] sm:$0xff] %v431_v26  ;;  %513 = vst [vmem:[%s1162_s20 + $0xc8] sm:$0xff] %v471_v27  ;;  %v532_v57 = vadd.f32 %v431_v26, %v1183_v24  ;;  %v556_v58 = vadd.f32 %v471_v27, %v1185_v25  ;;  %v577_v61 = vmul.f32 %v431_v26, %v431_v26 }
 0x106   : > { %v433_v30 = vpop.f32.mrf.mxu0  ;;  %v1193_v31 = vpop.f32.mrf.mxu1  ;;  %v593_v63 = vmul.f32 %v471_v27, %v471_v27 }
 0x107   : > { %524 = vadd.xlane.f32.xlu0 %v523_v28  ;;  %527 = vadd.xlane.f32.xlu1 %v526_v29  ;;  %498 = vst [vmem:[%s1162_s20 + $0x50] sm:$0xff] %v433_v30  ;;  %514 = vst [vmem:[%s1162_s20 + $0xd0] sm:$0xff] %v1193_v31  ;;  %v612_v0 = vadd.f32 %v577_v61, %v576_v60  ;;  %v578_v2 = vmul.f32 %v433_v30, %v433_v30 }
 0x108   : > { %v435_v32 = vpop.f32.mrf.mxu0  ;;  %v475_v33 = vpop.f32.mrf.mxu1  ;;  %v636_v4 = vadd.f32 %v593_v63, %v592_v62  ;;  %v594_v6 = vmul.f32 %v1193_v31, %v1193_v31 }
 0x109   : > { %499 = vst [vmem:[%s1162_s20 + $0x58] sm:$0xff] %v435_v32  ;;  %515 = vst [vmem:[%s1162_s20 + $0xd8] sm:$0xff] %v475_v33  ;;  %v535_v59 = vadd.f32 %v435_v32, %v433_v30  ;;  %v559_v1 = vadd.f32 %v475_v33, %v1193_v31  ;;  %v579_v3 = vmul.f32 %v435_v32, %v435_v32 }
 0x10a   : > { %v439_v38 = vpop.f32.mrf.mxu0  ;;  %v1200_v39 = vpop.f32.mrf.mxu1  ;;  %v595_v7 = vmul.f32 %v475_v33, %v475_v33 }
 0x10b   : > { %551 = vadd.xlane.f32.xlu0 %v550_v34  ;;  %530 = vadd.xlane.f32.xlu1 %v529_v35  ;;  %500 = vst [vmem:[%s1162_s20 + $0x60] sm:$0xff] %v439_v38  ;;  %516 = vst [vmem:[%s1162_s20 + $0xe0] sm:$0xff] %v1200_v39  ;;  %v615_v5 = vadd.f32 %v579_v3, %v578_v2  ;;  %v580_v12 = vmul.f32 %v439_v38, %v439_v38 }
 0x10c   : > { %v441_v42 = vpop.f32.mrf.mxu0  ;;  %v481_v43 = vpop.f32.mrf.mxu1  ;;  %v639_v8 = vadd.f32 %v595_v7, %v594_v6  ;;  %v596_v14 = vmul.f32 %v1200_v39, %v1200_v39 }
 0x10d   : > { %501 = vst [vmem:[%s1162_s20 + $0x68] sm:$0xff] %v441_v42  ;;  %517 = vst [vmem:[%s1162_s20 + $0xe8] sm:$0xff] %v481_v43  ;;  %v538_v9 = vadd.f32 %v441_v42, %v439_v38  ;;  %v562_v10 = vadd.f32 %v481_v43, %v1200_v39  ;;  %v581_v13 = vmul.f32 %v441_v42, %v441_v42 }
 0x10e   : > { %v443_v48 = vpop.f32.mrf.mxu0  ;;  %v483_v49 = vpop.f32.mrf.mxu1  ;;  %v597_v15 = vmul.f32 %v481_v43, %v481_v43 }
 0x10f   : > { %607 = vadd.xlane.f32.xlu0 %v606_v44  ;;  %554 = vadd.xlane.f32.xlu1 %v553_v45  ;;  %502 = vst [vmem:[%s1162_s20 + $0x70] sm:$0xff] %v443_v48  ;;  %518 = vst [vmem:[%s1162_s20 + $0xf0] sm:$0xff] %v483_v49  ;;  %v618_v17 = vadd.f32 %v581_v13, %v580_v12  ;;  %v582_v19 = vmul.f32 %v443_v48, %v443_v48 }
 0x110   : > { %v445_v50 = vpop.f32.mrf.mxu0  ;;  %v485_v51 = vpop.f32.mrf.mxu1  ;;  %v642_v21 = vadd.f32 %v597_v15, %v596_v14  ;;  %v598_v23 = vmul.f32 %v483_v49, %v483_v49 }
 0x111   : > { %503 = vst [vmem:[%s1162_s20 + $0x78] sm:$0xff] %v445_v50  ;;  %519 = vst [vmem:[%s1162_s20 + $0xf8] sm:$0xff] %v485_v51  ;;  %v541_v11 = vadd.f32 %v445_v50, %v443_v48  ;;  %v583_v16 = vmul.f32 %v445_v50, %v445_v50  ;;  %v565_v18 = vadd.f32 %v485_v51, %v483_v49 }
 0x112   : > { %v599_v20 = vmul.f32 %v485_v51, %v485_v51 }
 0x113   : > { %631 = vadd.xlane.f32.xlu0 %v630_v52  ;;  %610 = vadd.xlane.f32.xlu1 %v609_v53  ;;  %v621_v22 = vadd.f32 %v583_v16, %v582_v19 }
 0x114   : > { %v645_v24 = vadd.f32 %v599_v20, %v598_v23 }
 0x117   : > { %634 = vadd.xlane.f32.xlu1 %v633_v56  ;;  %533 = vadd.xlane.f32.xlu0 %v532_v57 }
 0x11b   : > { %557 = vadd.xlane.f32.xlu0 %v556_v58  ;;  %536 = vadd.xlane.f32.xlu1 %v535_v59 }
 0x11f   : > { %613 = vadd.xlane.f32.xlu0 %v612_v0  ;;  %560 = vadd.xlane.f32.xlu1 %v559_v1 }
 0x123   : > { %637 = vadd.xlane.f32.xlu0 %v636_v4  ;;  %616 = vadd.xlane.f32.xlu1 %v615_v5 }
 0x127   : > { %640 = vadd.xlane.f32.xlu1 %v639_v8  ;;  %539 = vadd.xlane.f32.xlu0 %v538_v9 }
 0x12b   : > { %563 = vadd.xlane.f32.xlu0 %v562_v10  ;;  %542 = vadd.xlane.f32.xlu1 %v541_v11 }
 0x12f   : > { %619 = vadd.xlane.f32.xlu0 %v618_v17  ;;  %566 = vadd.xlane.f32.xlu1 %v565_v18 }
 0x133   : > { %643 = vadd.xlane.f32.xlu0 %v642_v21  ;;  %622 = vadd.xlane.f32.xlu1 %v621_v22 }
 0x137   : > { %646 = vadd.xlane.f32.xlu1 %v645_v24 }
 0x180   : > { %v522_v25 = vpop.xlane.xlu0 %521 }
 0x181   : > { %653 = vst.msk [vmem:[%s1230_s23] sm:$0xff] %vm652_vm0, %v522_v25 }
 0x184   : > { %v549_v26 = vpop.xlane.xlu1 %548  ;;  %v546_v27 = vpop.xlane.xlu0 %545 }
 0x185   : > { %662 = vst.msk [vmem:[%s1230_s23 + $0x48] sm:$0xff] %vm652_vm0, %v549_v26  ;;  %661 = vst.msk [vmem:[%s1230_s23 + $0x40] sm:$0xff] %vm652_vm0, %v546_v27 }
 0x188   : > { %v602_v28 = vpop.xlane.xlu0 %601  ;;  %v605_v29 = vpop.xlane.xlu1 %604 }
 0x189   : > { %669 = vst.msk [vmem:[%s1241_s25] sm:$0xff] %vm652_vm0, %v602_v28  ;;  %670 = vst.msk [vmem:[%s1241_s25 + $0x8] sm:$0xff] %vm652_vm0, %v605_v29 }
 0x18c   : > { %v626_v30 = vpop.xlane.xlu0 %625  ;;  %v629_v31 = vpop.xlane.xlu1 %628 }
 0x18d   : > { %677 = vst.msk [vmem:[%s1241_s25 + $0x40] sm:$0xff] %vm652_vm0, %v626_v30  ;;  %678 = vst.msk [vmem:[%s1241_s25 + $0x48] sm:$0xff] %vm652_vm0, %v629_v31 }
 0x190   : > { %v525_v32 = vpop.xlane.xlu0 %524  ;;  %v528_v33 = vpop.xlane.xlu1 %527 }
 0x191   : > { %654 = vst.msk [vmem:[%s1230_s23 + $0x8] sm:$0xff] %vm652_vm0, %v525_v32  ;;  %655 = vst.msk [vmem:[%s1230_s23 + $0x10] sm:$0xff] %vm652_vm0, %v528_v33 }
 0x194   : > { %v552_v34 = vpop.xlane.xlu0 %551  ;;  %v531_v35 = vpop.xlane.xlu1 %530 }
 0x195   : > { %663 = vst.msk [vmem:[%s1230_s23 + $0x50] sm:$0xff] %vm652_vm0, %v552_v34  ;;  %656 = vst.msk [vmem:[%s1230_s23 + $0x18] sm:$0xff] %vm652_vm0, %v531_v35 }
 0x198   : > { %v608_v36 = vpop.xlane.xlu0 %607  ;;  %v555_v37 = vpop.xlane.xlu1 %554 }
 0x199   : > { %671 = vst.msk [vmem:[%s1241_s25 + $0x10] sm:$0xff] %vm652_vm0, %v608_v36  ;;  %664 = vst.msk [vmem:[%s1230_s23 + $0x58] sm:$0xff] %vm652_vm0, %v555_v37 }
 0x19c   : > { %v632_v38 = vpop.xlane.xlu0 %631  ;;  %v611_v39 = vpop.xlane.xlu1 %610 }
 0x19d   : > { %679 = vst.msk [vmem:[%s1241_s25 + $0x50] sm:$0xff] %vm652_vm0, %v632_v38  ;;  %672 = vst.msk [vmem:[%s1241_s25 + $0x18] sm:$0xff] %vm652_vm0, %v611_v39 }
 0x1a0   : > { %v635_v40 = vpop.xlane.xlu1 %634  ;;  %v534_v41 = vpop.xlane.xlu0 %533 }
 0x1a1   : > { %680 = vst.msk [vmem:[%s1241_s25 + $0x58] sm:$0xff] %vm652_vm0, %v635_v40  ;;  %657 = vst.msk [vmem:[%s1230_s23 + $0x20] sm:$0xff] %vm652_vm0, %v534_v41 }
 0x1a4   : > { %v558_v42 = vpop.xlane.xlu0 %557  ;;  %v537_v43 = vpop.xlane.xlu1 %536 }
 0x1a5   : > { %665 = vst.msk [vmem:[%s1230_s23 + $0x60] sm:$0xff] %vm652_vm0, %v558_v42  ;;  %658 = vst.msk [vmem:[%s1230_s23 + $0x28] sm:$0xff] %vm652_vm0, %v537_v43 }
 0x1a8   : > { %v614_v44 = vpop.xlane.xlu0 %613  ;;  %v561_v45 = vpop.xlane.xlu1 %560 }
 0x1a9   : > { %673 = vst.msk [vmem:[%s1241_s25 + $0x20] sm:$0xff] %vm652_vm0, %v614_v44  ;;  %666 = vst.msk [vmem:[%s1230_s23 + $0x68] sm:$0xff] %vm652_vm0, %v561_v45 }
 0x1ac   : > { %v638_v46 = vpop.xlane.xlu0 %637  ;;  %v617_v47 = vpop.xlane.xlu1 %616 }
 0x1ad   : > { %681 = vst.msk [vmem:[%s1241_s25 + $0x60] sm:$0xff] %vm652_vm0, %v638_v46  ;;  %674 = vst.msk [vmem:[%s1241_s25 + $0x28] sm:$0xff] %vm652_vm0, %v617_v47 }
 0x1b0   : > { %v641_v48 = vpop.xlane.xlu1 %640  ;;  %v540_v49 = vpop.xlane.xlu0 %539 }
 0x1b1   : > { %682 = vst.msk [vmem:[%s1241_s25 + $0x68] sm:$0xff] %vm652_vm0, %v641_v48  ;;  %659 = vst.msk [vmem:[%s1230_s23 + $0x30] sm:$0xff] %vm652_vm0, %v540_v49 }
 0x1b4   : > { %v564_v50 = vpop.xlane.xlu0 %563  ;;  %v543_v51 = vpop.xlane.xlu1 %542 }
 0x1b5   : > { %667 = vst.msk [vmem:[%s1230_s23 + $0x70] sm:$0xff] %vm652_vm0, %v564_v50  ;;  %660 = vst.msk [vmem:[%s1230_s23 + $0x38] sm:$0xff] %vm652_vm0, %v543_v51 }
 0x1b8   : > { %v620_v52 = vpop.xlane.xlu0 %619  ;;  %v567_v53 = vpop.xlane.xlu1 %566 }
 0x1b9   : > { %675 = vst.msk [vmem:[%s1241_s25 + $0x30] sm:$0xff] %vm652_vm0, %v620_v52  ;;  %668 = vst.msk [vmem:[%s1230_s23 + $0x78] sm:$0xff] %vm652_vm0, %v567_v53 }
 0x1bc   : > { %v644_v54 = vpop.xlane.xlu0 %643  ;;  %v623_v55 = vpop.xlane.xlu1 %622 }
 0x1bd   : > { %683 = vst.msk [vmem:[%s1241_s25 + $0x70] sm:$0xff] %vm652_vm0, %v644_v54  ;;  %676 = vst.msk [vmem:[%s1241_s25 + $0x38] sm:$0xff] %vm652_vm0, %v623_v55 }
 0x1c0   : > { %v647_v56 = vpop.xlane.xlu1 %646 }
 0x1c1   : > { %684 = vst.msk [vmem:[%s1241_s25 + $0x78] sm:$0xff] %vm652_vm0, %v647_v56 }
 0x1c2 PF: > { %s15_s17 = sadd.s32 1, %s1037_s17   ;;  %s1315_s15 = smov %s1033_s16 }
 0x1c3   : > { %p12_p5 = scmp.ge.s32.totalorder %s15_s17, 4   ;;  %s1316_s16 = smov %s1318_s18 }
 0x1c5   :  { %14 = sbr.rel (!%p12_p5) target bundleno = 2 (0x2), region = 90 }

</bundles_post_ra>
